<compile_context>
chip_gen: v5e
topology: v5e:2x2
jax: 0.10.0
libtpu: 0.0.40
codegen_flags: <defaults>
</compile_context>

<pallas_src>
import functools

import jax
import jax.numpy as jnp
from jax.experimental import pallas as pl
from jax.experimental.pallas import tpu as pltpu

LANES = 128
SUBLANES = 8


def _vmem_capacity_bytes():
    """Physical per-core VMEM; conservative fallback if the query is unavailable."""
    try:
        return int(pltpu.get_tpu_info().vmem_capacity_bytes)
    except Exception:
        return 64 * 1024 * 1024  # v7x per-TC physical VMEM (smallest of the three gens)


# --------------------------------------------------------------------------------------
# Fused single-pass kernel (VMEM-resident inputs): sum -> mean -> subtract in one body.
# --------------------------------------------------------------------------------------
def _fused_center_kernel(x_ref, o_ref, *, inv_n):
    xf = x_ref[...].astype(jnp.float32)
    mean = jnp.sum(xf) * inv_n           # divide by the TRUE element count
    o_ref[...] = (xf - mean).astype(o_ref.dtype)


# --------------------------------------------------------------------------------------
# Pass 1 (streaming path): per-core partial sums into a resident (1, 8, 128) f32 block.
# --------------------------------------------------------------------------------------
def _partial_sum_kernel(x_ref, psum_ref, *, rows, br, tiles_half):
    c = pl.program_id(0)                 # "parallel" core-split axis (2)
    i = pl.program_id(1)                 # "arbitrary" reduction axis

    @pl.when(i == 0)
    def _():
        psum_ref[...] = jnp.zeros_like(psum_ref)

    # Global row-block index covered by this (core, step) pair.  When the tile
    # count is odd the second core overshoots by one tile; that tile (and the
    # garbage rows of the boundary tile) are masked to zero below.
    t = c * tiles_half + i
    valid = rows - t * br                # rows of this tile that hold real data
    row_id = jax.lax.broadcasted_iota(jnp.int32, (br, 1), 0)
    xf = jnp.where(row_id < valid, x_ref[...].astype(jnp.float32), 0.0)

    # Sublane-group fold: (br,128) -> (br/8, 8, 128) summed over axis 0 stays on
    # the VPU (1024 parallel f32 accumulation lanes: no per-tile XLU reduce in
    # the steady state and much better f32 accuracy for very large N).
    fold = jnp.sum(xf.reshape(br // SUBLANES, SUBLANES, LANES), axis=0)
    psum_ref[...] = psum_ref[...] + fold          # broadcast into (1, 8, 128)


# --------------------------------------------------------------------------------------
# Pass 2 (streaming path): tiled elementwise subtract; mean arrives on the SMEM path.
# --------------------------------------------------------------------------------------
def _subtract_kernel(mean_ref, x_ref, o_ref):
    mean = mean_ref[0, 0]
    o_ref[...] = (x_ref[...].astype(jnp.float32) - mean).astype(o_ref.dtype)


def centered_layer(x, *, block_rows=8192):
    """X - X.mean() over all elements (torch CenteredLayer semantics)."""
    orig_shape = x.shape
    orig_dtype = x.dtype
    assert jnp.issubdtype(orig_dtype, jnp.floating), "CenteredLayer kernel expects a floating dtype"

    n = int(x.size)
    dtype_bytes = jnp.dtype(orig_dtype).itemsize
    inv_n = 1.0 / float(n)
    vmem_cap = _vmem_capacity_bytes()

    # ---------------- Fused single-pass fast path ----------------
    # in + out + f32 temporaries must fit with headroom.  2N HBM bytes, one launch,
    # and no pad/copy/slice at all (reshapes below are free bitcasts).
    fused_need = n * (2 * dtype_bytes + 8) + (2 << 20)
    if fused_need <= vmem_cap // 3:
        if n % LANES == 0:
            view = x.reshape(n // LANES, LANES)                       # lane-dense 2D view
        elif x.ndim >= 2:
            view = x.reshape(-1, orig_shape[-1])                      # collapse leading dims
        else:
            view = x.reshape(1, -1)
        vmem_limit = int(min(vmem_cap // 2, max(16 << 20, fused_need + (8 << 20))))
        out = pl.pallas_call(
            functools.partial(_fused_center_kernel, inv_n=inv_n),
            out_shape=jax.ShapeDtypeStruct(view.shape, orig_dtype),
            in_specs=[pl.BlockSpec(memory_space=pltpu.MemorySpace.VMEM)],
            out_specs=pl.BlockSpec(memory_space=pltpu.MemorySpace.VMEM),
            compiler_params=pltpu.CompilerParams(vmem_limit_bytes=vmem_limit),
            cost_estimate=pl.CostEstimate(
                flops=2 * n, transcendentals=0, bytes_accessed=2 * n * dtype_bytes),
        )(view)
        return out.reshape(orig_shape)

    # ---------------- Streaming two-pass path ----------------
    flat = x.reshape(-1)
    # Lane-dense 2D view.  For n % 128 == 0 (the common case for NN tensors) this is a
    # free bitcast reshape, i.e. no pad and no extra HBM traffic.  Only truly unaligned
    # sizes pay a pad-to-128 copy plus a final slice.
    # TODO(synk): stitch the <128-element tail separately to drop the pad copy for
    # unaligned large inputs too.
    if n % LANES != 0:
        n_lane = ((n + LANES - 1) // LANES) * LANES
        flat = jnp.pad(flat, (0, n_lane - n))       # zero pad: never perturbs the sum
    else:
        n_lane = n
    rows = n_lane // LANES
    x2d = flat.reshape(rows, LANES)

    # Block rows: multiple of 8, never larger than the array (~4 MiB f32 blocks by default).
    br = max(SUBLANES, min(block_rows, (rows // SUBLANES) * SUBLANES))
    tiles = pl.cdiv(rows, br)                       # last tile may be partial (masked in-kernel)
    tiles_half = pl.cdiv(tiles, 2)                  # leading "parallel" axis of 2 -> both TCs on v7x

    block_bytes = br * LANES * max(dtype_bytes, 4)
    # Need-based budget (double-buffered in + out + f32 temps), capped at half the
    # physical per-core VMEM so v7x's 64 MiB is never over-committed.
    vmem_limit = int(min(vmem_cap // 2, max(16 << 20, 5 * block_bytes + (4 << 20))))

    def _p1_in_map(c, i):
        # Clamp fully-out-of-range tiles back in bounds; their contribution is masked to 0.
        return (jnp.minimum(c * tiles_half + i, tiles - 1), 0)

    # ---- Pass 1: per-core (8,128) f32 partial sums ----
    psum = pl.pallas_call(
        functools.partial(_partial_sum_kernel, rows=rows, br=br, tiles_half=tiles_half),
        out_shape=jax.ShapeDtypeStruct((2, SUBLANES, LANES), jnp.float32),
        grid=(2, tiles_half),
        in_specs=[pl.BlockSpec((br, LANES), _p1_in_map)],
        out_specs=pl.BlockSpec((1, SUBLANES, LANES), lambda c, i: (c, 0, 0)),
        compiler_params=pltpu.CompilerParams(
            dimension_semantics=("parallel", "arbitrary"),
            vmem_limit_bytes=vmem_limit,
        ),
        cost_estimate=pl.CostEstimate(
            flops=n_lane, transcendentals=0, bytes_accessed=n_lane * dtype_bytes),
    )(x2d)

    # Global mean over the TRUE element count; tiny final reduce stays in XLA.
    mean2d = (jnp.sum(psum) * inv_n).reshape(1, 1).astype(jnp.float32)

    # ---- Pass 2: tiled elementwise subtract (mean on the SMEM scalar path) ----
    out2d = pl.pallas_call(
        _subtract_kernel,
        out_shape=jax.ShapeDtypeStruct((rows, LANES), orig_dtype),
        grid=(tiles,),
        in_specs=[
            pl.BlockSpec(memory_space=pltpu.MemorySpace.SMEM),   # (1,1) mean scalar
            pl.BlockSpec((br, LANES), lambda i: (i, 0)),
        ],
        out_specs=pl.BlockSpec((br, LANES), lambda i: (i, 0)),
        compiler_params=pltpu.CompilerParams(
            dimension_semantics=("parallel",),    # megacore sharding where available
            vmem_limit_bytes=vmem_limit,
        ),
        cost_estimate=pl.CostEstimate(
            flops=n_lane, transcendentals=0, bytes_accessed=2 * n_lane * dtype_bytes),
    )(mean2d, x2d)

    out_flat = out2d.reshape(-1)
    if n_lane != n:
        out_flat = out_flat[:n]
    return out_flat.reshape(orig_shape)


if __name__ == "__main__":
    key = jax.random.PRNGKey(0)

    # Small NCHW input consistent with the module's forward: (B=2, C=4, H=16, W=16).
    x = jax.random.normal(key, (2, 4, 16, 16), dtype=jnp.float32)
    y = jax.block_until_ready(centered_layer(x))
    y_ref = x - jnp.mean(x)
    assert y.shape == x.shape and y.dtype == x.dtype
    assert jnp.allclose(y, y_ref, atol=1e-5, rtol=1e-5)
    assert abs(float(jnp.mean(y))) < 1e-5

    # Tiny odd (non-128-multiple) shape exercises the unaligned fused view.
    x2 = jax.random.normal(jax.random.PRNGKey(0), (3, 5, 7, 11), dtype=jnp.float32)
    y2 = jax.block_until_ready(centered_layer(x2))
    y2_ref = x2 - jnp.mean(x2)
    assert y2.shape == x2.shape and y2.dtype == x2.dtype
    assert jnp.allclose(y2, y2_ref, atol=1e-5, rtol=1e-5)

    # Moderate tensor exercises the streaming two-pass path (partial last tile masked).
    x3 = jax.random.normal(jax.random.PRNGKey(0), (7, 3, 512, 512), dtype=jnp.float32)
    y3 = jax.block_until_ready(centered_layer(x3))
    y3_ref = x3 - jnp.mean(x3)
    assert y3.shape == x3.shape and y3.dtype == x3.dtype
    assert jnp.allclose(y3, y3_ref, atol=1e-5, rtol=1e-5)

    print("KERNEL_OK")
</pallas_src>

<mosaic_0001>
module attributes {stable_mosaic.version = 11 : i64} {
  func.func @_fused_center_kernel(%arg0: memref<16x128xf32, #tpu.memory_space<vmem>>, %arg1: memref<16x128xf32, #tpu.memory_space<vmem>>) attributes {dimension_semantics = [], scalar_prefetch = 0 : i64, scratch_operands = 0 : i64, tpu.core_type = #tpu.core_type<tc>} {
    %c0 = arith.constant 0 : index
    %c0_0 = arith.constant 0 : index
    %0 = vector.load %arg0[%c0, %c0_0] : memref<16x128xf32, #tpu.memory_space<vmem>>, vector<16x128xf32>
    %1 = vector.shape_cast %0 : vector<16x128xf32> to vector<1x16x128xf32>
    %cst = arith.constant dense<0.000000e+00> : vector<1xf32>
    %2 = vector.multi_reduction <add>, %1, %cst [1, 2] : vector<1x16x128xf32> to vector<1xf32>
    %3 = vector.shape_cast %2 : vector<1xf32> to vector<1x1x1xf32>
    %4 = vector.extract %3[0, 0, 0] : f32 from vector<1x1x1xf32>
    %cst_1 = arith.constant 4.8828125E-4 : f32
    %5 = arith.mulf %4, %cst_1 : f32
    %6 = vector.broadcast %5 : f32 to vector<16x128xf32>
    %7 = arith.subf %0, %6 : vector<16x128xf32>
    %c0_2 = arith.constant 0 : index
    %c0_3 = arith.constant 0 : index
    %8 = vector.load %arg1[%c0_2, %c0_3] : memref<16x128xf32, #tpu.memory_space<vmem>>, vector<16x128xf32>
    tpu.vector_store %arg1[%c0_2, %c0_3], %7 {strides = array<i32>} : memref<16x128xf32, #tpu.memory_space<vmem>>, vector<16x128xf32>,
    return
  }
}

</mosaic_0001>

<bundles_post_ra>
// kernel: tpu_custom_call.1
= control target key start
LH: loop header
LB: loop body
LE: loop exit
PB: predicated region body
PF: predicated region fallthrough
CT: control target
= control target key end

     0   :  { %6 = vsyncpa [#allocation3], 0  ;;  %s146_s0 = inlined_call_operand.hbm [shape: f32[16,128], index: 0, kind: input, shape index: {}]   ;;  %s147_s1 = inlined_call_operand.hbm [shape: f32[16,128], index: 1, kind: output, shape index: {}]  }
   0x1   :  { %7 = vsyncpa [#allocation4], 0  ;;  %s12_s8 = sshll.u32 %s146_s0, 4  ;;  %s120_s9 = smov [#allocation2]   ;;  %s13_s8 = int_to_ptr.hbm [resolvable:$true] %s12_s8 }
   0x2   :  { %s14_s10 = sshll.u32 %s120_s9, 4  ;;  %s121_s11 = smov 128   ;;  %s15_s10 = int_to_ptr.vmem [resolvable:$true] %s14_s10 }
   0x3   :  { %s122_s12 = smov 8  }
   0x4   :  { %20 = dma.hbm_to_vmem [thread:$0]  %s13_s8, 256, %s15_s10, [#allocation3], %s121_s11, %s121_s11, %s122_s12  }
   0x5   :  { %116 = dma.done.wait [#allocation3], 256  }
   0x6   :  { %117 = vsyncadd [#allocation3], 4294967040  ;;  %v25_v0 = vld [vmem:[#allocation2] sm:$0xff]  ;;  %v26_v1 = vld [vmem:[#allocation2 + $0x8] sm:$0xff]  ;;  %s123_s14 = smov [#allocation5]   ;;  %s49_s18 = sshll.u32 %s147_s1, 4  ;;  %s50_s18 = int_to_ptr.hbm [resolvable:$true] %s49_s18 }
   0x7   :  { %v27_v2 = vadd.f32 %v26_v1, %v25_v0  ;;  %s47_s15 = sshll.u32 %s123_s14, 4  ;;  %s48_s15 = int_to_ptr.vmem [resolvable:$true] %s47_s15 }
   0x9   :  { %28 = vadd.xlane.f32.xlu0 %v27_v2 }
  0x7c   :  { %v29_v3 = vpop.xlane.xlu0 %28 }
  0x7d   :  { %v30_v4 = vrot.slane %v29_v3, 4 }
  0x7f   :  { %v31_v5 = vadd.f32 %v30_v4, %v29_v3 }
  0x81   :  { %v32_v6 = vrot.slane %v31_v5, 2 }
  0x83   :  { %v33_v7 = vadd.f32 %v32_v6, %v31_v5 }
  0x85   :  { %v34_v8 = vrot.slane %v33_v7, 1 }
  0x87   :  { %v35_v9 = vadd.f32 %v34_v8, %v33_v7 }
  0x89   :  { %62 = vpush %v35_v9 }
  0xba   :  { %s63_s0 = spop %62 }
  0xbb   :  { %s37_s13 = smul.f32 0.00048828125, %s63_s0 }
  0xbd   :  { %v38_v10 = vstv %s37_s13 }
  0xbe   :  { %v39_v11 = vsub.f32 %v25_v0, %v38_v10  ;;  %v40_v12 = vsub.f32 %v26_v1, %v38_v10 }
  0xc0   :  { %41 = vst [vmem:[#allocation5] sm:$0xff] %v39_v11 }
  0xc1   :  { %42 = vst [vmem:[#allocation5 + $0x8] sm:$0xff] %v40_v12 }
  0xc2   :  { %55 = dma.vmem_to_hbm [thread:$0]  %s48_s15, 256, %s50_s18, [#allocation4], %s121_s11, %s121_s11, %s122_s12  }
  0xc3   :  { %118 = dma.done.wait [#allocation4], 256  }
  0xc4   :  { %119 = vsyncadd [#allocation4], 4294967040 }
  0xc5   :  { %60 = vsyncpa [#allocation3], 1 }
  0xc6   :  { %61 = vsyncpa [#allocation4], 1 }

</bundles_post_ra>
